<compile_context>
chip_gen: v7x
topology: tpu7x:2x2x1
jax: 0.10.0
libtpu: 0.0.40
codegen_flags: <defaults>
</compile_context>

<pallas_src>
import functools
import math

import jax
import jax.numpy as jnp
from jax import lax
from jax.experimental import pallas as pl
from jax.experimental.pallas import tpu as pltpu

_INV_SQRT2 = 1.0 / math.sqrt(2.0)

# ~2 MiB per f32 block buffer -> ~8 MiB with double-buffered input + output,
# comfortably under the 32 MiB scoped-VMEM default on v5e/v6e/v7x.
_TARGET_BLOCK_ELEMS = 512 * 1024
_LANE_CANDIDATES = (2048, 1024, 512, 256, 128)


def _adaptive_activation_kernel(a_ref, x_ref, o_ref, *, base_activation):
    # a_ref: (1, 1) f32 scalar parameter in SMEM
    # x_ref / o_ref: (block_rows, lane) tiles in VMEM, kept in the input dtype in HBM
    a = a_ref[0, 0]
    x = x_ref[...].astype(jnp.float32)  # upcast in vregs only; HBM traffic stays narrow
    if base_activation == "gelu":
        # a*x + (1-a)*0.5*x*(1+erf(x/sqrt2))  ==  x*(a + (1-a)*0.5*(1+erf(x/sqrt2)))
        out = x * (a + (1.0 - a) * 0.5 * (1.0 + lax.erf(x * _INV_SQRT2)))
    elif base_activation == "swish":
        out = a * x + (1.0 - a) * (x * jax.nn.sigmoid(x))
    else:  # 'tanh' and the module's default fallback branch
        out = a * x + (1.0 - a) * jnp.tanh(x)
    o_ref[...] = out.astype(o_ref.dtype)


def _run_kernel(x2d: jax.Array, a: jax.Array, base_activation: str) -> jax.Array:
    rows, lane = x2d.shape
    block_rows = max(8, ((_TARGET_BLOCK_ELEMS // lane) // 8) * 8)
    if rows <= block_rows:
        block_rows = rows  # single block == full array dims (small inputs)
    grid = (pl.cdiv(rows, block_rows),)

    a_smem = jnp.asarray(a, dtype=jnp.float32).reshape(1, 1)
    kernel = functools.partial(_adaptive_activation_kernel, base_activation=base_activation)

    return pl.pallas_call(
        kernel,
        out_shape=jax.ShapeDtypeStruct((rows, lane), x2d.dtype),
        grid_spec=pltpu.PrefetchScalarGridSpec(
            num_scalar_prefetch=0,
            grid=grid,
            in_specs=[
                pl.BlockSpec(memory_space=pltpu.MemorySpace.SMEM),   # scalar parameter a
                pl.BlockSpec((block_rows, lane), lambda i: (i, 0)),  # x tile
            ],
            out_specs=pl.BlockSpec((block_rows, lane), lambda i: (i, 0)),
        ),
        compiler_params=pltpu.CompilerParams(
            dimension_semantics=("parallel",),  # elementwise grid -> shard across TCs (v7x megacore)
        ),
    )(a_smem, x2d)


def adaptive_activation(x: jax.Array, a: jax.Array, base_activation: str = "gelu") -> jax.Array:
    """Apply the adaptive activation elementwise. x: any shape/float dtype, a: scalar param."""
    orig_shape = x.shape
    n = x.size

    lane = next((c for c in _LANE_CANDIDATES if n % c == 0), None)

    if lane is not None:
        # Common path: lane-dense view, no wrapper-side pad / cast / slice.
        x2d = jnp.ravel(x).reshape(n // lane, lane)
        out2d = _run_kernel(x2d, a, base_activation)
        return out2d.reshape(orig_shape)

    # Ragged fallback (element count not a multiple of 128): pad the flat tail with zeros
    # (0 -> 0 under every base activation, tail sliced off afterwards).
    lane = 128
    rows = ((pl.cdiv(n, lane) + 7) // 8) * 8
    x2d = jnp.pad(jnp.ravel(x), (0, rows * lane - n)).reshape(rows, lane)
    out2d = _run_kernel(x2d, a, base_activation)
    return out2d.reshape(-1)[:n].reshape(orig_shape)


def _reference_gelu(x, a):
    base = jax.nn.gelu(x.astype(jnp.float32), approximate=False)
    return a * x.astype(jnp.float32) + (1.0 - a) * base


if __name__ == "__main__":
    key = jax.random.PRNGKey(0)
    # deterministic parameter init, matching __init__: a = initial_param = 0.1
    a = jnp.float32(0.1)

    # NCHW conv-style activation map
    x = jax.random.normal(key, (2, 4, 16, 16), dtype=jnp.float32)
    out = jax.block_until_ready(adaptive_activation(x, a, base_activation="gelu"))
    ref = _reference_gelu(x, a)
    assert out.shape == x.shape and out.dtype == x.dtype
    assert jnp.allclose(out, ref, atol=1e-5, rtol=1e-5), float(jnp.max(jnp.abs(out - ref)))

    # bf16 I/O path: HBM traffic stays bf16, compute in f32 vregs
    xb = x.astype(jnp.bfloat16)
    outb = jax.block_until_ready(adaptive_activation(xb, a, base_activation="gelu"))
    refb = _reference_gelu(xb.astype(jnp.float32), a)
    assert outb.shape == xb.shape and outb.dtype == jnp.bfloat16
    assert jnp.allclose(outb.astype(jnp.float32), refb, atol=2e-2, rtol=2e-2)

    # ragged-size fallback path (element count not a multiple of 128)
    xr = jax.random.normal(jax.random.PRNGKey(1), (3, 5, 7, 11), dtype=jnp.float32)
    outr = jax.block_until_ready(adaptive_activation(xr, a, base_activation="gelu"))
    refr = _reference_gelu(xr, a)
    assert outr.shape == xr.shape
    assert jnp.allclose(outr, refr, atol=1e-5, rtol=1e-5)

    # tanh variant of the module
    outt = jax.block_until_ready(adaptive_activation(x, a, base_activation="tanh"))
    reft = a * x + (1.0 - a) * jnp.tanh(x)
    assert jnp.allclose(outt, reft, atol=1e-5, rtol=1e-5)

    print("KERNEL_OK")
</pallas_src>

<mosaic_0001>
module attributes {stable_mosaic.version = 11 : i64} {
  func.func @_adaptive_activation_kernel(%arg0: i32, %arg1: memref<1x1xf32, #tpu.memory_space<smem>>, %arg2: memref<1x2048xf32, #tpu.memory_space<vmem>>, %arg3: memref<1x2048xf32, #tpu.memory_space<vmem>>) attributes {dimension_semantics = [#tpu.dimension_semantics<parallel>], iteration_bounds = array<i64: 1>, scalar_prefetch = 0 : i64, scratch_operands = 0 : i64, tpu.core_type = #tpu.core_type<tc>, window_params = [{transform_indices = @transform_0, window_bounds = array<i64: 1, 1>}, {transform_indices = @transform_1, window_bounds = array<i64: 1, 2048>}, {transform_indices = @transform_2, window_bounds = array<i64: 1, 2048>}]} {
    %c0 = arith.constant 0 : index
    %c0_0 = arith.constant 0 : index
    %0 = memref.load %arg1[%c0, %c0_0] : memref<1x1xf32, #tpu.memory_space<smem>>
    %c0_1 = arith.constant 0 : index
    %c0_2 = arith.constant 0 : index
    %1 = vector.load %arg2[%c0_1, %c0_2] : memref<1x2048xf32, #tpu.memory_space<vmem>>, vector<1x2048xf32>
    %cst = arith.constant 1.000000e+00 : f32
    %2 = arith.subf %cst, %0 : f32
    %cst_3 = arith.constant 5.000000e-01 : f32
    %3 = arith.mulf %2, %cst_3 : f32
    %cst_4 = arith.constant 0.707106769 : f32
    %4 = vector.broadcast %cst_4 : f32 to vector<1x2048xf32>
    %5 = arith.mulf %1, %4 : vector<1x2048xf32>
    %6 = math.erf %5 : vector<1x2048xf32>
    %cst_5 = arith.constant 1.000000e+00 : f32
    %7 = vector.broadcast %cst_5 : f32 to vector<1x2048xf32>
    %8 = arith.addf %7, %6 : vector<1x2048xf32>
    %9 = vector.broadcast %3 : f32 to vector<1x2048xf32>
    %10 = arith.mulf %9, %8 : vector<1x2048xf32>
    %11 = vector.broadcast %0 : f32 to vector<1x2048xf32>
    %12 = arith.addf %11, %10 : vector<1x2048xf32>
    %13 = arith.mulf %1, %12 : vector<1x2048xf32>
    %c0_6 = arith.constant 0 : index
    %c0_7 = arith.constant 0 : index
    %14 = vector.load %arg3[%c0_6, %c0_7] : memref<1x2048xf32, #tpu.memory_space<vmem>>, vector<1x2048xf32>
    tpu.vector_store %arg3[%c0_6, %c0_7], %13 {strides = array<i32>} : memref<1x2048xf32, #tpu.memory_space<vmem>>, vector<1x2048xf32>,
    return
  }
  func.func @transform_0(%arg0: i32) -> (i32, i32) {
    %c0_i32 = arith.constant 0 : i32
    %c0_i32_0 = arith.constant 0 : i32
    %c0_i32_1 = arith.constant 0 : i32
    return %c0_i32, %c0_i32_0 : i32, i32
  }
  func.func @transform_1(%arg0: i32) -> (i32, i32) {
    %c0_i32 = arith.constant 0 : i32
    %c0_i32_0 = arith.constant 0 : i32
    return %arg0, %c0_i32 : i32, i32
  }
  func.func @transform_2(%arg0: i32) -> (i32, i32) {
    %c0_i32 = arith.constant 0 : i32
    %c0_i32_0 = arith.constant 0 : i32
    return %arg0, %c0_i32 : i32, i32
  }
}

</mosaic_0001>

<bundles_post_ra>
// kernel: tpu_custom_call.1
= control target key start
LH: loop header
LB: loop body
LE: loop exit
PB: predicated region body
PF: predicated region fallthrough
CT: control target
= control target key end

     0   :  { %8 = vsyncpa [#allocation4], 0  ;;  %s162_s0 = inlined_call_operand.<no memory space> [shape: f32[1,1], index: 0, kind: input, shape index: {}]   ;;  %s163_s1 = inlined_call_operand.hbm [shape: f32[1,2048], index: 1, kind: input, shape index: {}]   ;;  %s164_s2 = inlined_call_operand.hbm [shape: f32[1,2048], index: 2, kind: output, shape index: {}]  }
   0x1   :  { %9 = vsyncpa [#allocation5], 0  ;;  %s115_s9 = smov [#allocation3]   ;;  %s67_s13 = scalar_lea.hbm %s163_s1, 256 }
   0x2   :  { %s18_s10 = sshll.u32 %s115_s9, 4  ;;  %p68_p0 = scmp.ne.s32.totalorder %s163_s1, %s67_s13  ;;  %s19_s10 = int_to_ptr.vmem [resolvable:$true] %s18_s10 }
   0x3   :  { %p71_p1 = scmp.lt.u32.totalorder %s67_s13, %s163_s1 }
   0x5   :  { %p73_p2 = pnand %p71_p1, %p68_p0 }
   0x7   :  { %76 = shalt.err (!%p73_p2)
}
   0x8   :  { %s77_s18 = scalar_lea.vmem %s19_s10, 256  ;;  %p82_p4 = scmp.lt.s32.totalorder %s19_s10, %s19_s10 }
   0x9   :  { %p78_p3 = scmp.ne.s32.totalorder %s19_s10, %s77_s18  ;;  %p83_p5 = scmp.lt.s32.totalorder %s77_s18, %s77_s18 }
   0xb   :  { %p84_p6 = por %p83_p5, %p82_p4 }
   0xd   :  { %p85_p7 = pnand %p84_p6, %p78_p3 }
   0xf   :  { %88 = shalt.err (!%p85_p7)
}
  0x10   :  { %21 = dma.hbm_to_vmem [thread:$0]  %s163_s1, 256, %s19_s10, [#allocation4]  }
  0x11   :  { %111 = dma.done.wait [#allocation4], 256  }
  0x12   :  { %112 = vsyncadd [#allocation4], 4294967040  ;;  %v26_v0 = vld [vmem:[#allocation3] sm:$0xff]  ;;  %v27_v1 = vld [vmem:[#allocation3 + $0x8] sm:$0xff]  ;;  %s28_s23 = ssub.f32 1.0, %s162_s0  ;;  %v39_v8 = vstv %s162_s0  ;;  %s116_s1 = smov [#allocation6]  }
  0x13   :  { %v30_v2 = vmul.f32 0.70710677, %v26_v0  ;;  %v31_v3 = vmul.f32 0.70710677, %v27_v1  ;;  %s52_s27 = sshll.u32 %s116_s1, 4  ;;  %s53_s27 = int_to_ptr.vmem [resolvable:$true] %s52_s27 }
  0x14   :  { %s29_s24 = smul.f32 0.5, %s28_s23  ;;  %s89_s28 = scalar_lea.vmem %s53_s27, 256 }
  0x15   :  { %63 = verf.f32 %v30_v2  ;;  %p90_p8 = scmp.ne.s32.totalorder %s53_s27, %s89_s28  ;;  %p94_p9 = scmp.lt.s32.totalorder %s53_s27, %s53_s27 }
  0x16   :  { %65 = verf.f32 %v31_v3  ;;  %v36_v5 = vstv %s29_s24  ;;  %p95_p10 = scmp.lt.s32.totalorder %s89_s28, %s89_s28 }
  0x18   :  { %p96_p11 = por %p95_p10, %p94_p9 }
  0x1a   :  { %p97_p12 = pnand %p96_p11, %p90_p8 }
  0x1f   :  { %v64_v4 = vpop.eup %63 }
  0x20   :  { %v66_v6 = vpop.eup %65  ;;  %v34_v7 = vadd.f32 1.0, %v64_v4 }
  0x21   :  { %v35_v9 = vadd.f32 1.0, %v66_v6 }
  0x22   :  { %v37_v10 = vmul.f32 %v36_v5, %v34_v7 }
  0x23   :  { %v38_v11 = vmul.f32 %v36_v5, %v35_v9 }
  0x24   :  { %v40_v12 = vadd.f32 %v39_v8, %v37_v10 }
  0x25   :  { %v41_v13 = vadd.f32 %v39_v8, %v38_v11 }
  0x26   :  { %v42_v14 = vmul.f32 %v40_v12, %v26_v0 }
  0x27   :  { %v43_v15 = vmul.f32 %v41_v13, %v27_v1 }
  0x28   :  { %44 = vst [vmem:[#allocation6] sm:$0xff] %v42_v14 }
  0x29   :  { %45 = vst [vmem:[#allocation6 + $0x8] sm:$0xff] %v43_v15 }
  0x2a   :  { %100 = shalt.err (!%p97_p12)
}
  0x2b   :  { %s101_s30 = scalar_lea.hbm %s164_s2, 256 }
  0x2c   :  { %p102_p13 = scmp.ne.s32.totalorder %s164_s2, %s101_s30  ;;  %p105_p0 = scmp.lt.u32.totalorder %s101_s30, %s164_s2 }
  0x2e   :  { %p107_p1 = pnand %p105_p0, %p102_p13 }
  0x30   :  { %110 = shalt.err (!%p107_p1)
}
  0x31   :  { %55 = dma.vmem_to_hbm [thread:$0]  %s53_s27, 256, %s164_s2, [#allocation5]  }
  0x32   :  { %113 = dma.done.wait [#allocation5], 256  }
  0x33   :  { %114 = vsyncadd [#allocation5], 4294967040 }
  0x34   :  { %59 = vsyncpa [#allocation4], 1 }
  0x35   :  { %60 = vsyncpa [#allocation5], 1 }

</bundles_post_ra>
